<compile_context>
chip_gen: v5e
topology: v5e:2x2
jax: 0.10.0
libtpu: 0.0.40
codegen_flags: <defaults>
</compile_context>

<pallas_src>
import functools

import jax
import jax.numpy as jnp
from jax.experimental import pallas as pl
from jax.experimental.pallas import tpu as pltpu

L2_EPS = 1e-12   # F.normalize default eps (applied to the L2 norm)
IN_EPS = 1e-5    # nn.InstanceNorm2d default eps
LANE = 128       # TPU lane width


def _domain_norm_kernel(x_ref, gb_ref, o_ref, s0_ref, s1_ref, *inv_ref,
                        hw, l2, cache_inv):
    # x_ref block: (1, C, TILE); gb_ref: (2, C, 1) [gamma; beta] (f32)
    # s0_ref / s1_ref scratch: (1, C, 1) f32  (sum -> scale, sumsq -> shift)
    # inv_ref (optional): (1, 1, TILE) f32 cached inverse L2 norm (T == 1 only)
    p = pl.program_id(1)   # 0 = stats sweep, 1 = apply sweep
    t = pl.program_id(2)   # HW tile index

    x = x_ref[...].astype(jnp.float32)                          # (1, C, TILE)

    @pl.when(p == 0)
    def _stats():
        @pl.when(t == 0)
        def _init():
            s0_ref[...] = jnp.zeros_like(s0_ref)
            s1_ref[...] = jnp.zeros_like(s1_ref)

        if l2:
            # F.normalize(x, p=2, dim=1): one rsqrt per pixel (EUP) + VPU mul.
            # max(sq, eps^2) == (max(||x||, eps))^2, matching F.normalize.
            sq = jnp.sum(x * x, axis=1, keepdims=True)          # (1, 1, TILE)
            inv = jax.lax.rsqrt(jnp.maximum(sq, L2_EPS * L2_EPS))
            if cache_inv:
                inv_ref[0][...] = inv                           # reuse in pass 1
            xn = x * inv
        else:
            xn = x
        # One-pass moments; padded lanes are zero so plain sums are exact.
        # TODO(synk): per-lane partial sums (reduce only at finalize) would be
        # slightly more accurate for very large HW and cheaper on v7x.
        s0_ref[...] += jnp.sum(xn, axis=2, keepdims=True)       # sum x
        s1_ref[...] += jnp.sum(xn * xn, axis=2, keepdims=True)  # sum x^2

    @pl.when(p == 1)
    def _apply():
        @pl.when(t == 0)
        def _finalize():
            inv_hw = jnp.float32(1.0 / hw)                      # true HW, not padded
            mean = s0_ref[...] * inv_hw                         # (1, C, 1)
            var = jnp.maximum(s1_ref[...] * inv_hw - mean * mean, 0.0)
            gamma = gb_ref[0:1]                                 # (1, C, 1)
            beta = gb_ref[1:2]
            scale = gamma * jax.lax.rsqrt(var + IN_EPS)
            s0_ref[...] = scale                                 # reuse scratch
            s1_ref[...] = beta - mean * scale

        if l2:
            if cache_inv:
                xn = x * inv_ref[0][...]                        # cached inv norm
            else:
                sq = jnp.sum(x * x, axis=1, keepdims=True)
                xn = x * jax.lax.rsqrt(jnp.maximum(sq, L2_EPS * L2_EPS))
        else:
            xn = x
        # Fused per-channel scale/shift: one mul + one add per element.
        o_ref[...] = (xn * s0_ref[...] + s1_ref[...]).astype(o_ref.dtype)


def _vmem_target_bytes():
    """Generation-aware VMEM target: ~80% of physical (64 MiB on v7x,
    128 MiB on v5e/v6e), capped so we never request the whole core."""
    try:
        info = pltpu.get_tpu_info()
        cap = int(getattr(info, "vmem_capacity_bytes", 64 << 20))
    except Exception:  # e.g. interpret mode / unknown backend
        cap = 64 << 20
    return min(int(0.80 * cap), 112 << 20)


def _choose_tile(c, hw, itemsize, usable_vmem):
    """Lane tile (multiple of 128) for the HW axis.  Prefer a single tile that
    keeps the whole (C, HW) row resident so x is read from HBM exactly once;
    otherwise near-equal 128-granular tiles (no tile-multiple over-padding)."""
    # Per lane column: 2 bufs x (in + out) blocks + ~3 f32 in-kernel temporaries.
    per_col = c * (4 * itemsize + 12)
    budget_cols = max(LANE, (usable_vmem // per_col) // LANE * LANE)
    hw_cols = pl.cdiv(hw, LANE) * LANE
    if budget_cols >= hw_cols:
        return int(hw_cols), 1                   # whole row resident
    num_tiles = pl.cdiv(hw_cols, budget_cols)
    tile = pl.cdiv(hw_cols // LANE, num_tiles) * LANE
    return int(tile), int(num_tiles)


def domain_norm(x_nchw, gamma, beta, *, l2=True, tile_hw=None):
    """x_nchw: (N, C, H, W); gamma, beta: (C,). Returns (N, C, H, W)."""
    N, C, H, W = x_nchw.shape
    HW = H * W
    itemsize = jnp.dtype(x_nchw.dtype).itemsize

    vmem_target = _vmem_target_bytes()
    usable = vmem_target - (8 << 20)             # headroom: gb, scratch, internals

    if tile_hw is not None:
        assert tile_hw % LANE == 0
        tile = int(tile_hw)
        num_tiles = int(pl.cdiv(HW, tile))
    else:
        tile, num_tiles = _choose_tile(C, HW, itemsize, usable)
    hw_pad = tile * num_tiles

    # Cache the per-pixel inverse L2 norm only when the row is resident (T==1).
    cache_inv = bool(l2) and num_tiles == 1

    x = x_nchw.reshape(N, C, HW)
    if hw_pad != HW:
        # Zero padding keeps the spatial sums exact (we divide by the true HW).
        x = jnp.pad(x, ((0, 0), (0, 0), (0, hw_pad - HW)))

    gb = jnp.stack([gamma, beta]).astype(jnp.float32).reshape(2, C, 1)

    kernel = functools.partial(_domain_norm_kernel, hw=HW, l2=l2,
                               cache_inv=cache_inv)

    scratch = [pltpu.VMEM((1, C, 1), jnp.float32),   # sum  -> scale
               pltpu.VMEM((1, C, 1), jnp.float32)]   # sum2 -> shift
    if cache_inv:
        scratch.append(pltpu.VMEM((1, 1, tile), jnp.float32))

    # VMEM limit sized to what we actually use, clamped to the generation target.
    need = (4 * C * tile * itemsize              # double-buffered in + out blocks
            + 3 * C * tile * 4                   # f32 in-kernel temporaries
            + (4 * tile if cache_inv else 0)     # cached inverse-norm scratch
            + (4 << 20))                         # misc headroom
    vmem_limit = int(min(max(need, 16 << 20), vmem_target))

    out = pl.pallas_call(
        kernel,
        out_shape=jax.ShapeDtypeStruct((N, C, hw_pad), x_nchw.dtype),
        grid_spec=pltpu.PrefetchScalarGridSpec(
            num_scalar_prefetch=0,
            grid=(N, 2, num_tiles),
            in_specs=[
                # Same x tile read in both passes; when num_tiles == 1 the block
                # index never changes across the passes -> x DMA'd only once.
                pl.BlockSpec((1, C, tile), lambda n, p, t: (n, 0, t)),
                # gamma/beta packed; constant index_map -> fetched a single time.
                pl.BlockSpec((2, C, 1), lambda n, p, t: (0, 0, 0)),
            ],
            # Pin the output block at tile 0 during the stats pass (t*p == 0) so
            # nothing is written back until the apply pass fills it -> exactly
            # one lane-dense HBM write per element.
            out_specs=pl.BlockSpec((1, C, tile), lambda n, p, t: (n, 0, t * p)),
            scratch_shapes=scratch,
        ),
        compiler_params=pltpu.CompilerParams(
            dimension_semantics=("parallel", "arbitrary", "arbitrary"),
            vmem_limit_bytes=vmem_limit,
        ),
    )(x, gb)

    if hw_pad != HW:
        out = out[:, :, :HW]
    return out.reshape(N, C, H, W)


def domain_norm_ref(x, gamma, beta, *, l2=True):
    """Pure-JAX reference mirroring the PyTorch forward."""
    xf = x.astype(jnp.float32)
    if l2:
        norm = jnp.sqrt(jnp.sum(xf * xf, axis=1, keepdims=True))
        xf = xf / jnp.maximum(norm, L2_EPS)
    mean = jnp.mean(xf, axis=(2, 3), keepdims=True)
    var = jnp.mean((xf - mean) ** 2, axis=(2, 3), keepdims=True)
    x_hat = (xf - mean) * jax.lax.rsqrt(var + IN_EPS)
    return (x_hat * gamma.reshape(1, -1, 1, 1)
            + beta.reshape(1, -1, 1, 1)).astype(x.dtype)


if __name__ == "__main__":
    key = jax.random.PRNGKey(0)
    kx, kg, kb = jax.random.split(key, 3)

    # InstanceNorm2d(affine=True) params have shape (C,); perturb from the
    # ones/zeros init so the affine path is exercised.
    N, C, H, W = 2, 4, 16, 16
    x = jax.random.normal(kx, (N, C, H, W), dtype=jnp.float32)
    gamma = 1.0 + 0.1 * jax.random.normal(kg, (C,), dtype=jnp.float32)
    beta = 0.1 * jax.random.normal(kb, (C,), dtype=jnp.float32)

    # Single-tile regime (128-aligned HW -> no pad / no slice; inv-norm cached).
    out = jax.block_until_ready(domain_norm(x, gamma, beta))
    ref = domain_norm_ref(x, gamma, beta)
    assert out.shape == (N, C, H, W)
    assert jnp.allclose(out, ref, atol=2e-5, rtol=2e-5), \
        float(jnp.max(jnp.abs(out - ref)))

    # Multi-tile two-sweep path with a non-128-multiple HW (lane padding).
    H2, W2 = 20, 20
    x2 = jax.random.normal(kx, (N, C, H2, W2), dtype=jnp.float32)
    out2 = jax.block_until_ready(domain_norm(x2, gamma, beta, tile_hw=128))
    ref2 = domain_norm_ref(x2, gamma, beta)
    assert out2.shape == (N, C, H2, W2)
    assert jnp.allclose(out2, ref2, atol=2e-5, rtol=2e-5), \
        float(jnp.max(jnp.abs(out2 - ref2)))

    # l2=False path (plain InstanceNorm2d).
    out3 = jax.block_until_ready(domain_norm(x, gamma, beta, l2=False))
    ref3 = domain_norm_ref(x, gamma, beta, l2=False)
    assert jnp.allclose(out3, ref3, atol=2e-5, rtol=2e-5), \
        float(jnp.max(jnp.abs(out3 - ref3)))

    print("KERNEL_OK")
</pallas_src>

<mosaic_0001>
module attributes {stable_mosaic.version = 11 : i64} {
  func.func @_domain_norm_kernel(%arg0: i32, %arg1: i32, %arg2: i32, %arg3: memref<1x4x256xf32, #tpu.memory_space<vmem>>, %arg4: memref<2x4x1xf32, #tpu.memory_space<vmem>>, %arg5: memref<1x4x256xf32, #tpu.memory_space<vmem>>, %arg6: memref<1x4x1xf32, #tpu.memory_space<vmem>>, %arg7: memref<1x4x1xf32, #tpu.memory_space<vmem>>, %arg8: memref<1x1x256xf32, #tpu.memory_space<vmem>>) attributes {dimension_semantics = [#tpu.dimension_semantics<parallel>, #tpu.dimension_semantics<arbitrary>, #tpu.dimension_semantics<arbitrary>], iteration_bounds = array<i64: 2, 2, 1>, scalar_prefetch = 0 : i64, scratch_operands = 3 : i64, tpu.core_type = #tpu.core_type<tc>, window_params = [{transform_indices = @transform_0, window_bounds = array<i64: 1, 4, 256>}, {pipeline_mode = #tpu.pipeline_mode<synchronous>, transform_indices = @transform_1, window_bounds = array<i64: 2, 4, 1>}, {transform_indices = @transform_2, window_bounds = array<i64: 1, 4, 256>}]} {
    %c0 = arith.constant 0 : index
    %c0_0 = arith.constant 0 : index
    %c0_1 = arith.constant 0 : index
    %0 = vector.load %arg3[%c0, %c0_0, %c0_1] : memref<1x4x256xf32, #tpu.memory_space<vmem>>, vector<1x4x256xf32>
    %c0_i32 = arith.constant 0 : i32
    %1 = arith.cmpi eq, %arg1, %c0_i32 : i32
    %2 = arith.extui %1 : i1 to i32
    %c0_i32_2 = arith.constant 0 : i32
    %3 = arith.cmpi ne, %2, %c0_i32_2 : i32
    scf.if %3 {
      %c0_i32_4 = arith.constant 0 : i32
      %7 = arith.cmpi eq, %arg2, %c0_i32_4 : i32
      %8 = arith.extui %7 : i1 to i32
      %c0_i32_5 = arith.constant 0 : i32
      %9 = arith.cmpi ne, %8, %c0_i32_5 : i32
      scf.if %9 {
        %cst_24 = arith.constant 0.000000e+00 : f32
        %30 = vector.broadcast %cst_24 : f32 to vector<1x4x1xf32>
        %c0_25 = arith.constant 0 : index
        %c0_26 = arith.constant 0 : index
        %c0_27 = arith.constant 0 : index
        %31 = vector.load %arg6[%c0_25, %c0_26, %c0_27] : memref<1x4x1xf32, #tpu.memory_space<vmem>>, vector<1x4x1xf32>
        tpu.vector_store %arg6[%c0_25, %c0_26, %c0_27], %30 {strides = array<i32>} : memref<1x4x1xf32, #tpu.memory_space<vmem>>, vector<1x4x1xf32>,
        %cst_28 = arith.constant 0.000000e+00 : f32
        %32 = vector.broadcast %cst_28 : f32 to vector<1x4x1xf32>
        %c0_29 = arith.constant 0 : index
        %c0_30 = arith.constant 0 : index
        %c0_31 = arith.constant 0 : index
        %33 = vector.load %arg7[%c0_29, %c0_30, %c0_31] : memref<1x4x1xf32, #tpu.memory_space<vmem>>, vector<1x4x1xf32>
        tpu.vector_store %arg7[%c0_29, %c0_30, %c0_31], %32 {strides = array<i32>} : memref<1x4x1xf32, #tpu.memory_space<vmem>>, vector<1x4x1xf32>,
      } else {
      }
      %10 = arith.mulf %0, %0 : vector<1x4x256xf32>
      %cst = arith.constant dense<0.000000e+00> : vector<1x256xf32>
      %11 = vector.multi_reduction <add>, %10, %cst [1] : vector<1x4x256xf32> to vector<1x256xf32>
      %12 = vector.shape_cast %11 : vector<1x256xf32> to vector<1x1x256xf32>
      %cst_6 = arith.constant 1.000000e-24 : f32
      %13 = vector.broadcast %cst_6 : f32 to vector<1x1x256xf32>
      %14 = arith.maximumf %12, %13 : vector<1x1x256xf32>
      %15 = math.rsqrt %14 : vector<1x1x256xf32>
      %c0_7 = arith.constant 0 : index
      %c0_8 = arith.constant 0 : index
      %c0_9 = arith.constant 0 : index
      %16 = vector.load %arg8[%c0_7, %c0_8, %c0_9] : memref<1x1x256xf32, #tpu.memory_space<vmem>>, vector<1x1x256xf32>
      tpu.vector_store %arg8[%c0_7, %c0_8, %c0_9], %15 {strides = array<i32>} : memref<1x1x256xf32, #tpu.memory_space<vmem>>, vector<1x1x256xf32>,
      %17 = vector.broadcast %15 : vector<1x1x256xf32> to vector<1x4x256xf32>
      %18 = arith.mulf %0, %17 : vector<1x4x256xf32>
      %c0_10 = arith.constant 0 : index
      %c0_11 = arith.constant 0 : index
      %c0_12 = arith.constant 0 : index
      %19 = vector.load %arg6[%c0_10, %c0_11, %c0_12] : memref<1x4x1xf32, #tpu.memory_space<vmem>>, vector<1x4x1xf32>
      %cst_13 = arith.constant dense<0.000000e+00> : vector<1x4xf32>
      %20 = vector.multi_reduction <add>, %18, %cst_13 [2] : vector<1x4x256xf32> to vector<1x4xf32>
      %21 = vector.shape_cast %20 : vector<1x4xf32> to vector<1x4x1xf32>
      %22 = arith.addf %19, %21 : vector<1x4x1xf32>
      %c0_14 = arith.constant 0 : index
      %c0_15 = arith.constant 0 : index
      %c0_16 = arith.constant 0 : index
      %23 = vector.load %arg6[%c0_14, %c0_15, %c0_16] : memref<1x4x1xf32, #tpu.memory_space<vmem>>, vector<1x4x1xf32>
      tpu.vector_store %arg6[%c0_14, %c0_15, %c0_16], %22 {strides = array<i32>} : memref<1x4x1xf32, #tpu.memory_space<vmem>>, vector<1x4x1xf32>,
      %c0_17 = arith.constant 0 : index
      %c0_18 = arith.constant 0 : index
      %c0_19 = arith.constant 0 : index
      %24 = vector.load %arg7[%c0_17, %c0_18, %c0_19] : memref<1x4x1xf32, #tpu.memory_space<vmem>>, vector<1x4x1xf32>
      %25 = arith.mulf %18, %18 : vector<1x4x256xf32>
      %cst_20 = arith.constant dense<0.000000e+00> : vector<1x4xf32>
      %26 = vector.multi_reduction <add>, %25, %cst_20 [2] : vector<1x4x256xf32> to vector<1x4xf32>
      %27 = vector.shape_cast %26 : vector<1x4xf32> to vector<1x4x1xf32>
      %28 = arith.addf %24, %27 : vector<1x4x1xf32>
      %c0_21 = arith.constant 0 : index
      %c0_22 = arith.constant 0 : index
      %c0_23 = arith.constant 0 : index
      %29 = vector.load %arg7[%c0_21, %c0_22, %c0_23] : memref<1x4x1xf32, #tpu.memory_space<vmem>>, vector<1x4x1xf32>
      tpu.vector_store %arg7[%c0_21, %c0_22, %c0_23], %28 {strides = array<i32>} : memref<1x4x1xf32, #tpu.memory_space<vmem>>, vector<1x4x1xf32>,
    } else {
    }
    %c1_i32 = arith.constant 1 : i32
    %4 = arith.cmpi eq, %arg1, %c1_i32 : i32
    %5 = arith.extui %4 : i1 to i32
    %c0_i32_3 = arith.constant 0 : i32
    %6 = arith.cmpi ne, %5, %c0_i32_3 : i32
    scf.if %6 {
      %c0_i32_4 = arith.constant 0 : i32
      %7 = arith.cmpi eq, %arg2, %c0_i32_4 : i32
      %8 = arith.extui %7 : i1 to i32
      %c0_i32_5 = arith.constant 0 : i32
      %9 = arith.cmpi ne, %8, %c0_i32_5 : i32
      scf.if %9 {
        %c0_18 = arith.constant 0 : index
        %c0_19 = arith.constant 0 : index
        %c0_20 = arith.constant 0 : index
        %20 = vector.load %arg6[%c0_18, %c0_19, %c0_20] : memref<1x4x1xf32, #tpu.memory_space<vmem>>, vector<1x4x1xf32>
        %cst = arith.constant 3.906250e-03 : f32
        %21 = vector.broadcast %cst : f32 to vector<1x4x1xf32>
        %22 = arith.mulf %20, %21 : vector<1x4x1xf32>
        %c0_21 = arith.constant 0 : index
        %c0_22 = arith.constant 0 : index
        %c0_23 = arith.constant 0 : index
        %23 = vector.load %arg7[%c0_21, %c0_22, %c0_23] : memref<1x4x1xf32, #tpu.memory_space<vmem>>, vector<1x4x1xf32>
        %cst_24 = arith.constant 3.906250e-03 : f32
        %24 = vector.broadcast %cst_24 : f32 to vector<1x4x1xf32>
        %25 = arith.mulf %23, %24 : vector<1x4x1xf32>
        %26 = arith.mulf %22, %22 : vector<1x4x1xf32>
        %27 = arith.subf %25, %26 : vector<1x4x1xf32>
        %cst_25 = arith.constant 0.000000e+00 : f32
        %28 = vector.broadcast %cst_25 : f32 to vector<1x4x1xf32>
        %29 = arith.maximumf %27, %28 : vector<1x4x1xf32>
        %c0_26 = arith.constant 0 : index
        %c0_27 = arith.constant 0 : index
        %c0_28 = arith.constant 0 : index
        %30 = vector.load %arg4[%c0_26, %c0_27, %c0_28] : memref<2x4x1xf32, #tpu.memory_space<vmem>>, vector<1x4x1xf32>
        %c1 = arith.constant 1 : index
        %c0_29 = arith.constant 0 : index
        %c0_30 = arith.constant 0 : index
        %31 = vector.load %arg4[%c1, %c0_29, %c0_30] : memref<2x4x1xf32, #tpu.memory_space<vmem>>, vector<1x4x1xf32>
        %cst_31 = arith.constant 9.99999974E-6 : f32
        %32 = vector.broadcast %cst_31 : f32 to vector<1x4x1xf32>
        %33 = arith.addf %29, %32 : vector<1x4x1xf32>
        %34 = math.rsqrt %33 : vector<1x4x1xf32>
        %35 = arith.mulf %30, %34 : vector<1x4x1xf32>
        %c0_32 = arith.constant 0 : index
        %c0_33 = arith.constant 0 : index
        %c0_34 = arith.constant 0 : index
        %36 = vector.load %arg6[%c0_32, %c0_33, %c0_34] : memref<1x4x1xf32, #tpu.memory_space<vmem>>, vector<1x4x1xf32>
        tpu.vector_store %arg6[%c0_32, %c0_33, %c0_34], %35 {strides = array<i32>} : memref<1x4x1xf32, #tpu.memory_space<vmem>>, vector<1x4x1xf32>,
        %37 = arith.mulf %22, %35 : vector<1x4x1xf32>
        %38 = arith.subf %31, %37 : vector<1x4x1xf32>
        %c0_35 = arith.constant 0 : index
        %c0_36 = arith.constant 0 : index
        %c0_37 = arith.constant 0 : index
        %39 = vector.load %arg7[%c0_35, %c0_36, %c0_37] : memref<1x4x1xf32, #tpu.memory_space<vmem>>, vector<1x4x1xf32>
        tpu.vector_store %arg7[%c0_35, %c0_36, %c0_37], %38 {strides = array<i32>} : memref<1x4x1xf32, #tpu.memory_space<vmem>>, vector<1x4x1xf32>,
      } else {
      }
      %c0_6 = arith.constant 0 : index
      %c0_7 = arith.constant 0 : index
      %c0_8 = arith.constant 0 : index
      %10 = vector.load %arg8[%c0_6, %c0_7, %c0_8] : memref<1x1x256xf32, #tpu.memory_space<vmem>>, vector<1x1x256xf32>
      %11 = vector.broadcast %10 : vector<1x1x256xf32> to vector<1x4x256xf32>
      %12 = arith.mulf %0, %11 : vector<1x4x256xf32>
      %c0_9 = arith.constant 0 : index
      %c0_10 = arith.constant 0 : index
      %c0_11 = arith.constant 0 : index
      %13 = vector.load %arg6[%c0_9, %c0_10, %c0_11] : memref<1x4x1xf32, #tpu.memory_space<vmem>>, vector<1x4x1xf32>
      %14 = vector.broadcast %13 : vector<1x4x1xf32> to vector<1x4x256xf32>
      %15 = arith.mulf %12, %14 : vector<1x4x256xf32>
      %c0_12 = arith.constant 0 : index
      %c0_13 = arith.constant 0 : index
      %c0_14 = arith.constant 0 : index
      %16 = vector.load %arg7[%c0_12, %c0_13, %c0_14] : memref<1x4x1xf32, #tpu.memory_space<vmem>>, vector<1x4x1xf32>
      %17 = vector.broadcast %16 : vector<1x4x1xf32> to vector<1x4x256xf32>
      %18 = arith.addf %15, %17 : vector<1x4x256xf32>
      %c0_15 = arith.constant 0 : index
      %c0_16 = arith.constant 0 : index
      %c0_17 = arith.constant 0 : index
      %19 = vector.load %arg5[%c0_15, %c0_16, %c0_17] : memref<1x4x256xf32, #tpu.memory_space<vmem>>, vector<1x4x256xf32>
      tpu.vector_store %arg5[%c0_15, %c0_16, %c0_17], %18 {strides = array<i32>} : memref<1x4x256xf32, #tpu.memory_space<vmem>>, vector<1x4x256xf32>,
    } else {
    }
    return
  }
  func.func @transform_0(%arg0: i32, %arg1: i32, %arg2: i32) -> (i32, i32, i32) {
    %c0_i32 = arith.constant 0 : i32
    %c0_i32_0 = arith.constant 0 : i32
    return %arg0, %c0_i32, %arg2 : i32, i32, i32
  }
  func.func @transform_1(%arg0: i32, %arg1: i32, %arg2: i32) -> (i32, i32, i32) {
    %c0_i32 = arith.constant 0 : i32
    %c0_i32_0 = arith.constant 0 : i32
    %c0_i32_1 = arith.constant 0 : i32
    %c0_i32_2 = arith.constant 0 : i32
    return %c0_i32, %c0_i32_0, %c0_i32_1 : i32, i32, i32
  }
  func.func @transform_2(%arg0: i32, %arg1: i32, %arg2: i32) -> (i32, i32, i32) {
    %0 = arith.muli %arg2, %arg1 : i32
    %c0_i32 = arith.constant 0 : i32
    %c0_i32_0 = arith.constant 0 : i32
    return %arg0, %c0_i32, %0 : i32, i32, i32
  }
}

</mosaic_0001>

<bundles_post_ra>
// kernel: tpu_custom_call.1
= control target key start
LH: loop header
LB: loop body
LE: loop exit
PB: predicated region body
PF: predicated region fallthrough
CT: control target
= control target key end

     0   :  { %7 = vsyncpa [#allocation6], 0  ;;  %s889_s0 = inlined_call_operand.hbm [shape: f32[2,4,256], index: 0, kind: input, shape index: {}]   ;;  %s890_s1 = inlined_call_operand.vmem [shape: f32[2,4,1], index: 1, kind: input, shape index: {}]   ;;  %s891_s2 = inlined_call_operand.hbm [shape: f32[2,4,256], index: 2, kind: output, shape index: {}]  }
   0x1   :  { %9 = vsyncpa [#allocation6 + $0x1], 0 }
   0x2   :  { %10 = vsyncpa [#allocation7], 0 }
   0x3   :  { %12 = vsyncpa [#allocation7 + $0x1], 0  ;;  %s726_s9 = smov 0   ;;  %s728_s10 = smov 0  }
   0x4   :  { %s730_s11 = smov 0   ;;  %s732_s12 = smov 0  }
   0x5   :  { %s734_s13 = smov 0   ;;  %s736_s14 = smov 0  }
   0x6   :  { %s738_s15 = smov 0   ;;  %s740_s16 = smov 0  }
   0x7 LB: > { %s470_s17 = sadd.s32 4294967295, %s706_s16   ;;  %s471_s18 = sadd.s32 4294967294, %s706_s16   ;;  %s706_s16 = sphi %s740_s16, %s18_s16   ;;  %s702_s15 = sphi %s738_s15, %s902_s15   ;;  %s698_s14 = sphi %s736_s14, %s901_s14   ;;  %s694_s13 = sphi %s734_s13, %s900_s13   ;;  %s690_s12 = sphi %s732_s12, %s899_s12   ;;  %s686_s11 = sphi %s730_s11, %s898_s11   ;;  %s682_s10 = sphi %s728_s10, %s897_s10   ;;  %s678_s9 = sphi %s726_s9, %s896_s9  }
   0x8   : > { %s33_s19 = sadd.s32 1, %s698_s14  ;;  %s37_s20 = sadd.s32 1, %s702_s15 }
   0x9   : > { %p35_p0 = scmp.ge.s32.totalorder %s33_s19, 2  ;;  %s46_s21 = sadd.s32 1, %s686_s11 }
   0xa   : > { %p53_p1 = scmp.ne.s32.totalorder %s686_s11, %s682_s10  ;;  %p54_p2 = scmp.eq.s32.totalorder %s706_s16, 0 }
   0xb   : > { %s904_s19 = smov (%p35_p0, %s33_s19), 0  ;;  %s906_s20 = smov (!%p35_p0, %s37_s20), %s702_s15 }
   0xc   : > { %p777_p3 = por %p54_p2, %p53_p1  ;;  %p59_p4 = scmp.ne.s32.totalorder %s682_s10, %s678_s9 }
   0xd   : > { %p39_p5 = scmp.ge.s32.totalorder %s906_s20, 2  ;;  %p60_p6 = scmp.eq.s32.totalorder %s470_s17, 0 }
   0xe   : > { %p108_p7 = scmp.eq.s32.totalorder %s470_s17, 3  ;;  %p114_p8 = scmp.eq.s32.totalorder %s471_s18, 3 }
   0xf   : > { %s908_s20 = smov (%p39_p5, %s906_s20), 0  ;;  %p785_p9 = por %p60_p6, %p59_p4 }
  0x10   : > { %p789_p10 = por %p108_p7, %p53_p1  ;;  %s41_s25 = ssub.s32 %s702_s15, %s908_s20 }
  0x11   : > { %p795_p11 = por %p114_p8, %p59_p4  ;;  %p44_p12 = scmp.eq.s32.totalorder %s41_s25, 0 }
  0x12   : > { %p502_p13 = scmp.lt.s32.totalorder %s706_s16, 4  ;;  %s137_s27 = sand.u32 1, %s686_s11  }
  0x13   : > { %s802_s28 = scalar_select %p44_p12, %s686_s11, %s46_s21  }
  0x14   : > { %s474_s29 = sshll.u32 %s137_s27, 3  ;;  %s488_s30 = sshll.u32 %s702_s15, 3 }
  0x15   : > { %s148_s5 = scalar_lea.hbm %s889_s0, %s488_s30  ;;  %s141_s6 = scalar_lea.vmem [#allocation5], %s474_s29 }
  0x16   : > { %s152_s7 = sshll.u32 %s141_s6, 4  ;;  %s150_s8 = sshll.u32 %s148_s5, 4  ;;  %s153_s7 = int_to_ptr.vmem [resolvable:$true] %s152_s7  ;;  %s151_s8 = int_to_ptr.hbm [resolvable:$true] %s150_s8 }
  0x17   : > { %p495_p0 = pnand %p502_p13, %p777_p3  ;;  %p477_p1 = scmp.ge.s32.totalorder %s706_s16, 1 }
  0x18   : > { %p157_p2 = scmp.lt.s32.totalorder %s706_s16, 5  ;;  %s138_s17 = scalar_lea.sflag [#allocation6], %s137_s27 }
  0x19   : > { %497 = dma.hbm_to_vmem [thread:$0]  (!%p495_p0), %s151_s8, 128, %s153_s7, %s138_s17  }
  0x1a   : > { %p158_p4 = pnand %p477_p1, %p157_p2 }
  0x1b   : > { %s813_s18 = sand.u32 (!%p158_p4), 1, %s682_s10  }
  0x1c   : > { %161 = sbr.rel (%p158_p4) target bundleno = 417 (0x1a1), region = 28  ;;  %s478_s21 = sshll.u32 (!%p158_p4), %s813_s18, 3 }
  0x1d   : > { %s164_s25 = scalar_lea.sflag (!%p158_p4), [#allocation6], %s813_s18  ;;  %s167_s29 = scalar_lea.vmem (!%p158_p4), [#allocation5], %s478_s21 }
  0x21   : > { %669 = dma.done.wait (%p785_p9), %s164_s25, 128  }
  0x22   : > { %671 = vsyncadd (%p785_p9), %s164_s25, 4294967168  ;;  %v821_v0 = vld [vmem:[%s167_s29] sm:$0xff]  ;;  %s823_s22 = scalar_lea.vmem [#allocation8], %s478_s21  ;;  %p480_p3 = scmp.ne.s32.totalorder %s690_s12, 0 }
  0x24   : > { %196 = sbr.rel (%p480_p3) target bundleno = 228 (0xe4), region = 36 }
  0x29   : > { %v204_v1 = vmul.f32 %v821_v0, %v821_v0  ;;  %vm211_vm0 = vcmask 1043456   ;;  %v254_v31 = vlaneseq  ;;  %vm251_vm7 = vcmask 1040384  }
  0x2a   : > { %vm201_vm9 = vcmask 3072   ;;  %v708_v51 = vmov 0.0  }
  0x2b   : > { %206 = vst [vmem:[#allocation1] ss:$2 sm:$0xff] %v204_v1  ;;  %vm256_vm8 = vcmp.lt.s32.totalorder %v254_v31, 256 }
  0x2c   : > { %202 = vst.msk [vmem:[#allocation2] sm:$0xf] %vm201_vm9, %v708_v51 }
  0x2d   : > { %203 = vst.msk [vmem:[#allocation3] sm:$0xf] %vm201_vm9, %v708_v51 }
  0x32   : > { %v207_v2 = vld.sshfl [vmem:[#allocation1] sm:$0xff pattern:$0x75316420]  ;;  %v208_v3 = vld.sshfl [vmem:[#allocation1 + $0x8] sm:$0xff pattern:$0x75316420] }
  0x33   : > { %v212_v4 = vsel %vm211_vm0, %v207_v2, 0.0  ;;  %v219_v5 = vsel %vm211_vm0, %v208_v3, 0.0  ;;  %v263_v52 = vld [vmem:[#allocation2] sm:$0xf] }
  0x34   : > { %v213_v6 = vrot.slane %v212_v4, 4  ;;  %v220_v7 = vrot.slane %v219_v5, 4  ;;  %v278_v55 = vld [vmem:[#allocation3] sm:$0xf] }
  0x36   : > { %v214_v8 = vadd.f32 %v213_v6, %v212_v4  ;;  %v221_v9 = vadd.f32 %v220_v7, %v219_v5 }
  0x38   : > { %v215_v10 = vrot.slane %v214_v8, 2  ;;  %v222_v11 = vrot.slane %v221_v9, 2 }
  0x3a   : > { %v216_v12 = vadd.f32 %v215_v10, %v214_v8  ;;  %v223_v13 = vadd.f32 %v222_v11, %v221_v9 }
  0x3c   : > { %v217_v14 = vrot.slane %v216_v12, 1  ;;  %v224_v15 = vrot.slane %v223_v13, 1 }
  0x3e   : > { %v218_v16 = vadd.f32 %v217_v14, %v216_v12  ;;  %v225_v17 = vadd.f32 %v224_v15, %v223_v13 }
  0x40   : > { %v226_v18 = vmax.f32 %v218_v16, 1e-24  ;;  %v227_v19 = vmax.f32 %v225_v17, 1e-24 }
  0x42   : > { %571 = vrsqrt.f32 %v226_v18  ;;  %vm234_vm1 = vweird.f32 %v226_v18  ;;  %vm244_vm3 = vweird.f32 %v227_v19 }
  0x43   : > { %573 = vrsqrt.f32 %v227_v19 }
  0x48   : > { %v572_v20 = vpop.eup %571 }
  0x49   : > { %v574_v21 = vpop.eup %573  ;;  %v229_v22 = vmul.f32 %v572_v20, %v226_v18  ;;  %vm235_vm2 = vweird.f32 %v572_v20 }
  0x4a   : > { %v239_v23 = vmul.f32 %v574_v21, %v227_v19  ;;  %vm245_vm4 = vweird.f32 %v574_v21  ;;  %vm236_vm5 = vmor %vm234_vm1, %vm235_vm2 }
  0x4b   : > { %v230_v24 = vmul.f32 %v572_v20, %v229_v22  ;;  %vm246_vm6 = vmor %vm244_vm3, %vm245_vm4 }
  0x4c   : > { %v240_v25 = vmul.f32 %v574_v21, %v239_v23 }
  0x4d   : > { %v231_v26 = vmul.f32 0.5, %v230_v24 }
  0x4e   : > { %v241_v27 = vmul.f32 0.5, %v240_v25 }
  0x4f   : > { %v232_v28 = vsub.f32 1.5, %v231_v26 }
  0x50   : > { %v242_v29 = vsub.f32 1.5, %v241_v27 }
  0x51   : > { %v233_v30 = vmul.f32 %v572_v20, %v232_v28 }
  0x52   : > { %v243_v32 = vmul.f32 %v574_v21, %v242_v29 }
  0x53   : > { %v237_v33 = vsel %vm236_vm5, %v572_v20, %v233_v30 }
  0x54   : > { %v247_v34 = vsel %vm246_vm6, %v574_v21, %v243_v32 }
  0x55   : > { %v250_v35 = vrot.slane %v247_v34, 7  ;;  %v259_v36 = vrot.slane %v247_v34, 4 }
  0x57   : > { %v260_v37 = vsel %vm211_vm0, %v237_v33, %v259_v36  ;;  %v252_v38 = vsel %vm251_vm7, %v237_v33, %v250_v35 }
  0x58   : > { %v262_v39 = vmul.f32 %v260_v37, %v821_v0  ;;  %258 = vst.msk [vmem:[#allocation4] sm:$0x3] %vm256_vm8, %v252_v38 }
  0x5a   : > { %265 = vst [vmem:[#allocation1] ss:$2 sm:$0xff] %v262_v39  ;;  %v279_v40 = vmul.f32 %v262_v39, %v262_v39 }
  0x61   : > { %v266_v41 = vld.sshfl [vmem:[#allocation1] sm:$0xff pattern:$0x75316420]  ;;  %v267_v42 = vld.sshfl [vmem:[#allocation1 + $0x8] sm:$0xff pattern:$0x75316420] }
  0x62   : > { %v270_v43 = vsel %vm211_vm0, %v266_v41, 0.0  ;;  %v271_v44 = vsel %vm211_vm0, %v267_v42, 0.0  ;;  %281 = vst [vmem:[#allocation1] ss:$2 sm:$0xff] %v279_v40 }
  0x63   : > { %v272_v45 = vadd.f32 %v271_v44, %v270_v43 }
  0x65   : > { %273 = vadd.xlane.f32.xlu0 %v272_v45 }
  0x69   : > { %v282_v46 = vld.sshfl [vmem:[#allocation1] sm:$0xff pattern:$0x75316420]  ;;  %v283_v47 = vld.sshfl [vmem:[#allocation1 + $0x8] sm:$0xff pattern:$0x75316420] }
  0x6a   : > { %v286_v48 = vsel %vm211_vm0, %v282_v46, 0.0  ;;  %v287_v49 = vsel %vm211_vm0, %v283_v47, 0.0 }
  0x6b   : > { %v288_v50 = vadd.f32 %v287_v49, %v286_v48 }
  0x6d   : > { %289 = vadd.xlane.f32.xlu0 %v288_v50 }
  0xd8   : > { %v274_v53 = vpop.xlane.xlu0 %273 }
  0xd9   : > { %v275_v54 = vadd.f32 %v274_v53, %v263_v52 }
  0xdb   : > { %277 = vst.msk [vmem:[#allocation2] sm:$0xf] %vm201_vm9, %v275_v54 }
  0xe0   : > { %v290_v56 = vpop.xlane.xlu0 %289 }
  0xe1   : > { %v291_v57 = vadd.f32 %v290_v56, %v278_v55 }
  0xe3   : > { %292 = vst.msk [vmem:[#allocation3] sm:$0xf] %vm201_vm9, %v291_v57 }
  0xe4 PF: > { %p481_p5 = scmp.ne.s32.totalorder %s690_s12, 1 }
  0xe6   : > { %296 = sbr.rel (%p481_p5) target bundleno = 402 (0x192), region = 44 }
  0xeb   : > { %v301_v58 = vld [vmem:[#allocation2] sm:$0xf]  ;;  %v303_v59 = vld [vmem:[#allocation3] sm:$0xf]  ;;  %v709_v60 = vmov 0   ;;  %vm323_vm13 = vcmask 3072  }
  0xec   : > { %575 = vset.pattern.permute.xlu0 %v709_v60  ;;  %v302_v61 = vmul.f32 0.00390625, %v301_v58  ;;  %v304_v62 = vmul.f32 0.00390625, %v303_v59  ;;  %v308_v9 = vld [vmem:[%s890_s1] sm:$0xf]  ;;  %v482_v13 = vld [vmem:[%s890_s1 + $0x4] sm:$0xf] }
  0xed   : > { %v328_v18 = vld [vmem:[#allocation4] sm:$0x3]  ;;  %v710_v20 = vmov 839922192   ;;  %vm333_vm14 = vcmask 1043456  }
  0xee   : > { %v305_v63 = vmul.f32 %v302_v61, %v302_v61  ;;  %v331_v19 = vperm.slane %v328_v18, 1  ;;  %v343_v21 = vunpack.c.l.s4 %v710_v20  ;;  %v330_v22 = vperm.slane %v328_v18, 0 }
  0xf0   : > { %v306_v1 = vsub.f32 %v304_v62, %v305_v63  ;;  %v332_v23 = vrot.slane %v331_v19, 4  ;;  %v344_v25 = vunpack.c.0.s8 %v343_v21 }
  0xf2   : > { %v307_v2 = vmax.f32 %v306_v1, 0.0  ;;  %v334_v26 = vsel %vm333_vm14, %v330_v22, %v332_v23 }
  0xf3   : > { %v336_v27 = vmul.f32 %v334_v26, %v821_v0 }
  0xf4   : > { %v311_v3 = vadd.f32 1e-05, %v307_v2 }
  0xf6   : > { %576 = vrsqrt.f32 %v311_v3  ;;  %vm318_vm10 = vweird.f32 %v311_v3 }
  0xfc   : > { %v577_v4 = vpop.eup %576 }
  0xfd   : > { %v313_v5 = vmul.f32 %v577_v4, %v311_v3  ;;  %vm319_vm11 = vweird.f32 %v577_v4 }
  0xfe   : > { %vm320_vm12 = vmor %vm318_vm10, %vm319_vm11 }
  0xff   : > { %v314_v6 = vmul.f32 %v577_v4, %v313_v5 }
 0x101   : > { %v315_v7 = vmul.f32 0.5, %v314_v6 }
 0x103   : > { %v316_v8 = vsub.f32 1.5, %v315_v7 }
 0x105   : > { %v317_v10 = vmul.f32 %v577_v4, %v316_v8 }
 0x107   : > { %v321_v11 = vsel %vm320_vm12, %v577_v4, %v317_v10 }
 0x108   : > { %v322_v12 = vmul.f32 %v321_v11, %v308_v9 }
 0x10a   : > { %324 = vst.msk [vmem:[#allocation2] sm:$0xf] %vm323_vm13, %v322_v12  ;;  %v325_v14 = vmul.f32 %v322_v12, %v302_v61 }
 0x10c   : > { %v326_v15 = vsub.f32 %v482_v13, %v325_v14 }
 0x10e   : > { %327 = vst.msk [vmem:[#allocation3] sm:$0xf] %vm323_vm13, %v326_v15 }
 0x111   : > { %v337_v16 = vld [vmem:[#allocation2] sm:$0xf] }
 0x112   : > { %340 = vperm.xlu0 %575, %v337_v16  }
 0x115   : > { %v348_v17 = vld [vmem:[#allocation3] sm:$0xf] }
 0x11a   : > { %351 = vperm.xlu0 %575, %v348_v17  }
 0x184   : > { %v341_v24 = vpop.permute.xlu0 %340 }
 0x185   : > { %v345_v28 = vperm.slane %v341_v24, %v344_v25 }
 0x187   : > { %v347_v30 = vmul.f32 %v345_v28, %v336_v27 }
 0x18c   : > { %v352_v29 = vpop.permute.xlu0 %351 }
 0x18d   : > { %v356_v31 = vperm.slane %v352_v29, %v344_v25 }
 0x18f   : > { %v358_v32 = vadd.f32 %v356_v31, %v347_v30 }
 0x191   : > { %359 = vst [vmem:[%s823_s22] sm:$0xff] %v358_v32 }
 0x192 PF: > { %s489_s3 = sshll.u32 %s694_s13, 3  ;;  %s377_s7 = sshll.u32 %s823_s22, 4  ;;  %s378_s7 = int_to_ptr.vmem [resolvable:$true] %s377_s7 }
 0x193   : > { %s375_s6 = scalar_lea.hbm %s891_s2, %s489_s3  ;;  %s361_s17 = scalar_lea.sflag [#allocation7], %s813_s18 }
 0x194   : > { %s379_s8 = sshll.u32 %s375_s6, 4  ;;  %s628_s13 = scalar_lea.hbm %s891_s2, 16  ;;  %s380_s8 = int_to_ptr.hbm [resolvable:$true] %s379_s8 }
 0x195   : > { %s622_s21 = sshra.s32 %s380_s8, 4  ;;  %s623_s21 = int_to_ptr.hbm [resolvable:$true] %s622_s21 }
 0x196   : > { %s624_s25 = scalar_lea.hbm %s623_s21, 8  ;;  %p629_p9 = scmp.lt.s32.totalorder %s623_s21, %s891_s2 }
 0x197   : > { %p625_p6 = scmp.ne.s32.totalorder %s623_s21, %s624_s25  ;;  %p630_p12 = scmp.lt.s32.totalorder %s628_s13, %s624_s25 }
 0x199   : > { %p626_p7 = pnand %p625_p6, %p789_p10  ;;  %p631_p13 = por %p630_p12, %p629_p9 }
 0x19b   : > { %p627_p8 = pneg %p626_p7 }
 0x19d   : > { %p632_p0 = pnand %p631_p13, %p627_p8 }
 0x19f   : > { %635 = shalt.err (!%p632_p0)
}
 0x1a0   : > { %492 = dma.vmem_to_hbm [thread:$0]  (%p789_p10), %s378_s7, 128, %s380_s8, %s361_s17  }
 0x1a1 PF: > { %p503_p1 = scmp.ge.s32.totalorder %s706_s16, 2  ;;  %s391_s18 = sand.u32 1, %s678_s9  }
 0x1a2   : > { %s392_s22 = scalar_lea.sflag [#allocation7], %s391_s18 }
 0x1a3   : > { %p499_p2 = pnand %p503_p1, %p795_p11 }
 0x1a5   : > { %p500_p4 = pneg %p499_p2 }
 0x1a7   : > { %673 = dma.done.wait (%p500_p4), %s392_s22, 128  }
 0x1a8   : > { %675 = vsyncadd (%p500_p4), %s392_s22, 4294967168  ;;  %s18_s16 = sadd.s32 1, %s706_s16   ;;  %s896_s9 = smov %s682_s10 }
 0x1a9   : > { %p15_p3 = scmp.ge.s32.totalorder %s18_s16, 6   ;;  %s897_s10 = smov %s686_s11 }
 0x1aa   : > { %s898_s11 = smov %s802_s28  ;;  %s899_s12 = smov %s698_s14 }
 0x1ab   : > { %s900_s13 = smov %s702_s15  ;;  %s901_s14 = smov %s904_s19 }
 0x1ac   : > { %s902_s15 = smov %s908_s20  ;;  %17 = sbr.rel (!%p15_p3) target bundleno = 7 (0x7), region = 90 }
 0x1b1   :  { %398 = vsyncpa [#allocation6], 1 }
 0x1b2   :  { %400 = vsyncpa [#allocation6 + $0x1], 1 }
 0x1b3   :  { %401 = vsyncpa [#allocation7], 1 }
 0x1b4   :  { %403 = vsyncpa [#allocation7 + $0x1], 1 }

</bundles_post_ra>
